<compile_context>
chip_gen: v6e
topology: v6e:2x2x1
jax: 0.10.0
libtpu: 0.0.40
codegen_flags: <defaults>
</compile_context>

<pallas_src>
import jax
import jax.numpy as jnp
from jax import lax
from jax.experimental import pallas as pl
from jax.experimental.pallas import tpu as pltpu


def _round_up(x, m):
    return ((x + m - 1) // m) * m


def _block_disc_kernel(x_ref, w_ref, b_ref, o_ref, acc_ref):
    # x_ref: (tm, tk)   input tile
    # w_ref: (tn, tk)   weight tile in native PyTorch [out, in] layout
    # b_ref: (1, tn)    bias tile (indexed only by the N grid axis)
    # o_ref: (tm, tn)   output tile (resident across the K axis)
    # acc_ref: (tm, tn) f32 accumulator in VMEM scratch
    k = pl.program_id(2)

    @pl.when(k == 0)
    def _():
        acc_ref[...] = jnp.zeros_like(acc_ref)

    # MXU matmul; transpose of W folded into the contraction (x @ W.T).
    acc_ref[...] += lax.dot_general(
        x_ref[...], w_ref[...],
        dimension_numbers=(((1,), (1,)), ((), ())),
        preferred_element_type=jnp.float32,
    )

    @pl.when(k == pl.num_programs(2) - 1)
    def _():
        y = acc_ref[...] + b_ref[...].astype(jnp.float32)
        # LeakyReLU(0.2): valid as max(y, 0.2*y) since 0 < slope < 1.
        y = jnp.maximum(y, 0.2 * y)
        o_ref[...] = y.astype(o_ref.dtype)


def block_disc_forward(x, weight, bias, *, tm=None, tn=None, tk=None):
    """x: [B, in_dim], weight: [out_dim, in_dim] (PyTorch layout), bias: [out_dim]."""
    B, in_dim = x.shape
    out_dim = weight.shape[0]

    # Tile sizes: 128-aligned (v5e MXU granularity), capped so that double-
    # buffered x/w tiles + accumulator stay comfortably inside v7x's VMEM.
    tm = tm if tm is not None else min(_round_up(B, 8), 256)
    tn = tn if tn is not None else min(_round_up(out_dim, 128), 256)
    tk = tk if tk is not None else min(_round_up(in_dim, 128), 512)

    # Padded problem sizes (lane-dense output, divisible grid).
    M = _round_up(B, tm)
    N = _round_up(out_dim, tn)
    K = _round_up(in_dim, tk)

    # Zero-pad only when dims are not already aligned (no-op at real sizes).
    x_p = x if (M, K) == (B, in_dim) else jnp.pad(
        x, ((0, M - B), (0, K - in_dim)))
    w_p = weight if (N, K) == (out_dim, in_dim) else jnp.pad(
        weight, ((0, N - out_dim), (0, K - in_dim)))
    b_p = bias if N == out_dim else jnp.pad(bias, (0, N - out_dim))
    b2 = b_p.reshape(1, N)

    grid = (M // tm, N // tn, K // tk)

    out = pl.pallas_call(
        _block_disc_kernel,
        out_shape=jax.ShapeDtypeStruct((M, N), x.dtype),
        grid_spec=pltpu.PrefetchScalarGridSpec(
            num_scalar_prefetch=0,
            grid=grid,
            in_specs=[
                pl.BlockSpec((tm, tk), lambda i, j, k: (i, k)),   # x
                pl.BlockSpec((tn, tk), lambda i, j, k: (j, k)),   # W (native layout)
                pl.BlockSpec((1, tn), lambda i, j, k: (0, j)),    # bias (N only)
            ],
            out_specs=pl.BlockSpec((tm, tn), lambda i, j, k: (i, j)),
            scratch_shapes=[pltpu.VMEM((tm, tn), jnp.float32)],
        ),
        compiler_params=pltpu.CompilerParams(
            dimension_semantics=("parallel", "parallel", "arbitrary")),
    )(x_p, w_p, b2)

    # Strip padding back to the logical shape.
    if (M, N) != (B, out_dim):
        out = out[:B, :out_dim]
    return out


if __name__ == "__main__":
    # Small shapes consistent with the module: batch=8, in_dim=32, out_dim=64.
    B, in_dim, out_dim = 8, 32, 64

    key = jax.random.PRNGKey(0)
    kx, kw, kb = jax.random.split(key, 3)

    x = jax.random.normal(kx, (B, in_dim), dtype=jnp.float32)
    # Deterministic synthetic parameters (PyTorch Linear shapes: W [out,in], b [out]).
    bound = 1.0 / (in_dim ** 0.5)
    weight = jax.random.uniform(kw, (out_dim, in_dim), jnp.float32, -bound, bound)
    bias = jax.random.uniform(kb, (out_dim,), jnp.float32, -bound, bound)

    y = block_disc_forward(x, weight, bias)
    y = jax.block_until_ready(y)

    # Reference check in plain JAX (same math as nn.Linear + LeakyReLU(0.2)).
    ref = x @ weight.T + bias
    ref = jnp.where(ref >= 0, ref, 0.2 * ref)
    assert y.shape == (B, out_dim)
    assert jnp.allclose(y, ref, atol=1e-5, rtol=1e-5)

    print("KERNEL_OK")
</pallas_src>

<mosaic_0001>
module attributes {stable_mosaic.version = 11 : i64} {
  func.func @_block_disc_kernel(%arg0: i32, %arg1: i32, %arg2: i32, %arg3: memref<8x128xf32, #tpu.memory_space<vmem>>, %arg4: memref<128x128xf32, #tpu.memory_space<vmem>>, %arg5: memref<1x128xf32, #tpu.memory_space<vmem>>, %arg6: memref<8x128xf32, #tpu.memory_space<vmem>>, %arg7: memref<8x128xf32, #tpu.memory_space<vmem>>) attributes {dimension_semantics = [#tpu.dimension_semantics<parallel>, #tpu.dimension_semantics<parallel>, #tpu.dimension_semantics<arbitrary>], iteration_bounds = array<i64: 1, 1, 1>, scalar_prefetch = 0 : i64, scratch_operands = 1 : i64, tpu.core_type = #tpu.core_type<tc>, window_params = [{transform_indices = @transform_0, window_bounds = array<i64: 8, 128>}, {transform_indices = @transform_1, window_bounds = array<i64: 128, 128>}, {transform_indices = @transform_2, window_bounds = array<i64: 1, 128>}, {transform_indices = @transform_3, window_bounds = array<i64: 8, 128>}]} {
    %c0_i32 = arith.constant 0 : i32
    %0 = arith.cmpi eq, %arg2, %c0_i32 : i32
    %1 = arith.extui %0 : i1 to i32
    %c0_i32_0 = arith.constant 0 : i32
    %2 = arith.cmpi ne, %1, %c0_i32_0 : i32
    scf.if %2 {
      %cst_10 = arith.constant 0.000000e+00 : f32
      %12 = vector.broadcast %cst_10 : f32 to vector<8x128xf32>
      %c0_11 = arith.constant 0 : index
      %c0_12 = arith.constant 0 : index
      %13 = vector.load %arg7[%c0_11, %c0_12] : memref<8x128xf32, #tpu.memory_space<vmem>>, vector<8x128xf32>
      tpu.vector_store %arg7[%c0_11, %c0_12], %12 {strides = array<i32>} : memref<8x128xf32, #tpu.memory_space<vmem>>, vector<8x128xf32>,
    } else {
    }
    %c0 = arith.constant 0 : index
    %c0_1 = arith.constant 0 : index
    %3 = vector.load %arg7[%c0, %c0_1] : memref<8x128xf32, #tpu.memory_space<vmem>>, vector<8x128xf32>
    %c0_2 = arith.constant 0 : index
    %c0_3 = arith.constant 0 : index
    %4 = vector.load %arg3[%c0_2, %c0_3] : memref<8x128xf32, #tpu.memory_space<vmem>>, vector<8x128xf32>
    %c0_4 = arith.constant 0 : index
    %c0_5 = arith.constant 0 : index
    %5 = vector.load %arg4[%c0_4, %c0_5] : memref<128x128xf32, #tpu.memory_space<vmem>>, vector<128x128xf32>
    %cst = arith.constant dense<0.000000e+00> : vector<8x128xf32>
    %6 = tpu.matmul %4, %5, %cst {dimension_numbers = #tpu.dot_dimension_numbers<[1], [1], [0], [0], [0, 0, 1, 0], [], []>} : vector<8x128xf32>, vector<128x128xf32>, vector<8x128xf32> -> vector<8x128xf32>
    %7 = arith.addf %3, %6 : vector<8x128xf32>
    %c0_6 = arith.constant 0 : index
    %c0_7 = arith.constant 0 : index
    %8 = vector.load %arg7[%c0_6, %c0_7] : memref<8x128xf32, #tpu.memory_space<vmem>>, vector<8x128xf32>
    tpu.vector_store %arg7[%c0_6, %c0_7], %7 {strides = array<i32>} : memref<8x128xf32, #tpu.memory_space<vmem>>, vector<8x128xf32>,
    %c0_i32_8 = arith.constant 0 : i32
    %9 = arith.cmpi eq, %arg2, %c0_i32_8 : i32
    %10 = arith.extui %9 : i1 to i32
    %c0_i32_9 = arith.constant 0 : i32
    %11 = arith.cmpi ne, %10, %c0_i32_9 : i32
    scf.if %11 {
      %c0_10 = arith.constant 0 : index
      %c0_11 = arith.constant 0 : index
      %12 = vector.load %arg7[%c0_10, %c0_11] : memref<8x128xf32, #tpu.memory_space<vmem>>, vector<8x128xf32>
      %c0_12 = arith.constant 0 : index
      %c0_13 = arith.constant 0 : index
      %13 = vector.load %arg5[%c0_12, %c0_13] : memref<1x128xf32, #tpu.memory_space<vmem>>, vector<1x128xf32>
      %14 = vector.broadcast %13 : vector<1x128xf32> to vector<8x128xf32>
      %15 = arith.addf %12, %14 : vector<8x128xf32>
      %cst_14 = arith.constant 2.000000e-01 : f32
      %16 = vector.broadcast %cst_14 : f32 to vector<8x128xf32>
      %17 = arith.mulf %16, %15 : vector<8x128xf32>
      %18 = arith.maximumf %15, %17 : vector<8x128xf32>
      %c0_15 = arith.constant 0 : index
      %c0_16 = arith.constant 0 : index
      %19 = vector.load %arg6[%c0_15, %c0_16] : memref<8x128xf32, #tpu.memory_space<vmem>>, vector<8x128xf32>
      tpu.vector_store %arg6[%c0_15, %c0_16], %18 {strides = array<i32>} : memref<8x128xf32, #tpu.memory_space<vmem>>, vector<8x128xf32>,
    } else {
    }
    return
  }
  func.func @transform_0(%arg0: i32, %arg1: i32, %arg2: i32) -> (i32, i32) {
    %c0_i32 = arith.constant 0 : i32
    return %arg0, %arg2 : i32, i32
  }
  func.func @transform_1(%arg0: i32, %arg1: i32, %arg2: i32) -> (i32, i32) {
    %c0_i32 = arith.constant 0 : i32
    return %arg1, %arg2 : i32, i32
  }
  func.func @transform_2(%arg0: i32, %arg1: i32, %arg2: i32) -> (i32, i32) {
    %c0_i32 = arith.constant 0 : i32
    %c0_i32_0 = arith.constant 0 : i32
    return %c0_i32, %arg1 : i32, i32
  }
  func.func @transform_3(%arg0: i32, %arg1: i32, %arg2: i32) -> (i32, i32) {
    %c0_i32 = arith.constant 0 : i32
    return %arg0, %arg1 : i32, i32
  }
}

</mosaic_0001>

<bundles_post_ra>
// kernel: tpu_custom_call.1
= control target key start
LH: loop header
LB: loop body
LE: loop exit
PB: predicated region body
PF: predicated region fallthrough
CT: control target
= control target key end

     0   :  { %8 = vsyncpa [#allocation4], 0  ;;  %s332_s0 = inlined_call_operand.hbm [shape: f32[8,128], index: 0, kind: input, shape index: {}]   ;;  %s333_s1 = inlined_call_operand.hbm [shape: f32[128,128], index: 1, kind: input, shape index: {}]   ;;  %s334_s2 = inlined_call_operand.vmem [shape: f32[1,128], index: 2, kind: input, shape index: {}]   ;;  %s335_s3 = inlined_call_operand.hbm [shape: f32[8,128], index: 3, kind: output, shape index: {}]  }
   0x1   :  { %9 = vsyncpa [#allocation7], 0 }
   0x2   :  { %10 = vsyncpa [#allocation5], 0  ;;  %s293_s12 = smov [#allocation3]   ;;  %s294_s14 = smov [#allocation6]  }
   0x3   :  { %s17_s13 = sshll.u32 %s293_s12, 4  ;;  %s26_s15 = sshll.u32 %s294_s14, 4  ;;  %s18_s13 = int_to_ptr.vmem [resolvable:$true] %s17_s13  ;;  %s27_s15 = int_to_ptr.vmem [resolvable:$true] %s26_s15 }
   0x4   :  { %s235_s16 = scalar_lea.vmem %s18_s13, 128  ;;  %p240_p1 = scmp.lt.s32.totalorder %s18_s13, %s18_s13 }
   0x5   :  { %p236_p0 = scmp.ne.s32.totalorder %s18_s13, %s235_s16  ;;  %p241_p2 = scmp.lt.s32.totalorder %s235_s16, %s235_s16 }
   0x7   :  { %p242_p3 = por %p241_p2, %p240_p1 }
   0x9   :  { %p243_p4 = pnand %p242_p3, %p236_p0 }
   0xb   :  { %246 = shalt.err (!%p243_p4)
}
   0xc   :  { %20 = dma.hbm_to_vmem [thread:$0]  %s332_s0, 128, %s18_s13, [#allocation4]  }
   0xd   :  { %s255_s19 = scalar_lea.vmem %s27_s15, 2048  ;;  %p260_p6 = scmp.lt.s32.totalorder %s27_s15, %s27_s15 }
   0xe   :  { %p256_p5 = scmp.ne.s32.totalorder %s27_s15, %s255_s19  ;;  %p261_p7 = scmp.lt.s32.totalorder %s255_s19, %s255_s19 }
  0x10   :  { %p262_p8 = por %p261_p7, %p260_p6 }
  0x12   :  { %p263_p9 = pnand %p262_p8, %p256_p5 }
  0x14   :  { %266 = shalt.err (!%p263_p9)
}
  0x15   :  { %s295_s20 = smov 128   ;;  %s296_s21 = smov 8  }
  0x16   :  { %32 = dma.hbm_to_vmem [thread:$0]  %s333_s1, 2048, %s27_s15, [#allocation7], %s295_s20, %s295_s20, %s296_s21  }
  0x17   :  { %287 = dma.done.wait [#allocation4], 128  }
  0x18   :  { %288 = vsyncadd [#allocation4], 4294967168 }
  0x19   :  { %289 = dma.done.wait [#allocation7], 2048  }
  0x1a   :  { %290 = vsyncadd [#allocation7], 4294965248  ;;  %v297_v0 = vmov 0.0   ;;  %vm298_vm0 = vmmov 0   ;;  %v63_v1 = vld [vmem:[#allocation6 + $0x78] sm:$0xff]  ;;  %v62_v2 = vld [vmem:[#allocation6 + $0x70] sm:$0xff] }
  0x1b   :  { %185 = vmatprep.subr.mxu0 %v297_v0  ;;  %217 = vmatprep.mubr.msk.f32.mxu0 %vm298_vm0, %v297_v0  ;;  %v61_v3 = vld [vmem:[#allocation6 + $0x68] sm:$0xff]  ;;  %v60_v4 = vld [vmem:[#allocation6 + $0x60] sm:$0xff]  ;;  %v59_v5 = vld [vmem:[#allocation6 + $0x58] sm:$0xff]  ;;  %s299_s24 = smov [#allocation8]  }
  0x1c   :  { %186 = vmatpush3.xpose.msra.mxu0 %v63_v1  ;;  %v58_v6 = vld [vmem:[#allocation6 + $0x50] sm:$0xff]  ;;  %v57_v7 = vld [vmem:[#allocation6 + $0x48] sm:$0xff]  ;;  %v56_v8 = vld [vmem:[#allocation6 + $0x40] sm:$0xff]  ;;  %s157_s25 = sshll.u32 %s299_s24, 4  ;;  %s158_s25 = int_to_ptr.vmem [resolvable:$true] %s157_s25 }
  0x1d   :  { %187 = vmatprep.subr.mxu0 %v297_v0  ;;  %v55_v9 = vld [vmem:[#allocation6 + $0x38] sm:$0xff]  ;;  %v54_v10 = vld [vmem:[#allocation6 + $0x30] sm:$0xff]  ;;  %v53_v11 = vld [vmem:[#allocation6 + $0x28] sm:$0xff]  ;;  %s267_s26 = scalar_lea.vmem %s158_s25, 128  ;;  %p272_p11 = scmp.lt.s32.totalorder %s158_s25, %s158_s25 }
  0x1e   :  { %v52_v12 = vld [vmem:[#allocation6 + $0x20] sm:$0xff]  ;;  %v51_v13 = vld [vmem:[#allocation6 + $0x18] sm:$0xff]  ;;  %v50_v14 = vld [vmem:[#allocation6 + $0x10] sm:$0xff]  ;;  %p268_p10 = scmp.ne.s32.totalorder %s158_s25, %s267_s26  ;;  %p273_p12 = scmp.lt.s32.totalorder %s267_s26, %s267_s26 }
  0x1f   :  { %v49_v15 = vld [vmem:[#allocation6 + $0x8] sm:$0xff]  ;;  %v48_v16 = vld [vmem:[#allocation6] sm:$0xff]  ;;  %v47_v17 = vld [vmem:[#allocation3] sm:$0xff] }
  0x20   :  { %188 = vmatpush3.xpose.msra.mxu0 %v62_v2  ;;  %v167_v18 = vld [vmem:[%s334_s2] ss:$0 sm:$0xff]  ;;  %p274_p13 = por %p273_p12, %p272_p11 }
  0x21   :  { %189 = vmatprep.subr.mxu0 %v297_v0 }
  0x22   :  { %p275_p0 = pnand %p274_p13, %p268_p10 }
  0x24   :  { %190 = vmatpush3.xpose.msra.mxu0 %v61_v3 }
  0x25   :  { %191 = vmatprep.subr.mxu0 %v297_v0 }
  0x28   :  { %192 = vmatpush3.xpose.msra.mxu0 %v60_v4 }
  0x29   :  { %193 = vmatprep.subr.mxu0 %v297_v0 }
  0x2c   :  { %194 = vmatpush3.xpose.msra.mxu0 %v59_v5 }
  0x2d   :  { %195 = vmatprep.subr.mxu0 %v297_v0 }
  0x30   :  { %196 = vmatpush3.xpose.msra.mxu0 %v58_v6 }
  0x31   :  { %197 = vmatprep.subr.mxu0 %v297_v0 }
  0x34   :  { %198 = vmatpush3.xpose.msra.mxu0 %v57_v7 }
  0x35   :  { %199 = vmatprep.subr.mxu0 %v297_v0 }
  0x38   :  { %200 = vmatpush3.xpose.msra.mxu0 %v56_v8 }
  0x39   :  { %201 = vmatprep.subr.mxu0 %v297_v0 }
  0x3c   :  { %202 = vmatpush3.xpose.msra.mxu0 %v55_v9 }
  0x3d   :  { %203 = vmatprep.subr.mxu0 %v297_v0 }
  0x40   :  { %204 = vmatpush3.xpose.msra.mxu0 %v54_v10 }
  0x41   :  { %205 = vmatprep.subr.mxu0 %v297_v0 }
  0x44   :  { %206 = vmatpush3.xpose.msra.mxu0 %v53_v11 }
  0x45   :  { %207 = vmatprep.subr.mxu0 %v297_v0 }
  0x48   :  { %208 = vmatpush3.xpose.msra.mxu0 %v52_v12 }
  0x49   :  { %209 = vmatprep.subr.mxu0 %v297_v0 }
  0x4c   :  { %210 = vmatpush3.xpose.msra.mxu0 %v51_v13 }
  0x4d   :  { %211 = vmatprep.subr.mxu0 %v297_v0 }
  0x50   :  { %212 = vmatpush3.xpose.msra.mxu0 %v50_v14 }
  0x51   :  { %213 = vmatprep.subr.mxu0 %v297_v0 }
  0x54   :  { %214 = vmatpush3.xpose.msra.mxu0 %v49_v15 }
  0x55   :  { %215 = vmatprep.subr.mxu0 %v297_v0 }
  0x58   :  { %216 = vmatpush3.xpose.msra.mxu0 %v48_v16 }
  0x5b   :  { %218 = vmatmul.mubr.f32.vlgmr.msra.gmra.mxu0 %v47_v17 }
 0x11b   :  { %v130_v19 = vpop.f32.mrf.mxu0 }
 0x11c   :  { %v147_v20 = vadd.f32 %v167_v18, %v130_v19 }
 0x11d   :  { %v219_v21 = vpop.f32.mrf.mxu0 }
 0x11e   :  { %v148_v22 = vmul.f32 0.2, %v147_v20 }
 0x120   :  { %v149_v23 = vmax.f32 %v147_v20, %v148_v22 }
 0x122   :  { %150 = vst [vmem:[#allocation8] sm:$0xff] %v149_v23 }
 0x123   :  { %278 = shalt.err (!%p275_p0)
}
 0x124   :  { %160 = dma.vmem_to_hbm [thread:$0]  %s158_s25, 128, %s335_s3, [#allocation5]  }
 0x125   :  { %291 = dma.done.wait [#allocation5], 128  }
 0x126   :  { %292 = vsyncadd [#allocation5], 4294967168 }
 0x127   :  { %164 = vsyncpa [#allocation4], 1 }
 0x128   :  { %165 = vsyncpa [#allocation7], 1 }
 0x129   :  { %166 = vsyncpa [#allocation5], 1 }

</bundles_post_ra>
